<compile_context>
chip_gen: v6e
topology: v6e:2x2x1
jax: 0.10.0
libtpu: 0.0.40
codegen_flags: <defaults>
</compile_context>

<pallas_src>
import functools

import jax
import jax.numpy as jnp
from jax.experimental import pallas as pl
from jax.experimental.pallas import tpu as pltpu

_MIB = 1024 * 1024


def _round_up(x, m):
    return ((x + m - 1) // m) * m


def _focal_partial_kernel(logits_ref, target_ref, out_ref, *, n_rows,
                          native_reduce):
    # logits_ref: (TILE_N, C) native dtype; target_ref: (TILE_N, 1) int32
    # out_ref:    (1, 8, 128) f32 partial block (sublane 0 = ce_sum,
    #             sublane 1 = valid count).
    i = pl.program_id(0)

    x = logits_ref[...]                                   # native dtype tile
    tgt = target_ref[...]                                 # (TILE_N, 1) int32
    tn, n_classes = x.shape

    # Row-max and target select in the native dtype (packed bf16 VPU ops on
    # v6e/v7x); both are exact (no arithmetic rounding).  On v5e / f32 inputs
    # xr is f32.
    xr = x if native_reduce else x.astype(jnp.float32)
    m = jnp.max(xr, axis=-1, keepdims=True)               # (TILE_N, 1)

    # Target gather: single where+sum on the raw logits (no onehot cast+mul).
    class_ids = jax.lax.broadcasted_iota(jnp.int32, (tn, n_classes), 1)
    zero = jnp.array(0, dtype=xr.dtype)
    tgt_logit = jnp.sum(jnp.where(class_ids == tgt, xr, zero),
                        axis=-1, keepdims=True)           # exact: 1 hit / row

    # Only the shifted values feeding exp/sum are promoted to f32; `shifted`
    # dies right after exp.
    shifted = (xr - m).astype(jnp.float32)
    sumexp = jnp.sum(jnp.exp(shifted), axis=-1, keepdims=True)

    # ce = -log_softmax[target] = (m + log(sum exp(x - m))) - x[target]
    ce_per = (m.astype(jnp.float32) + jnp.log(sumexp)) - tgt_logit.astype(
        jnp.float32)                                      # (TILE_N, 1)

    # ignore_index=0 plus mask for out-of-bounds rows of a partial last tile.
    row_ids = i * tn + jax.lax.broadcasted_iota(jnp.int32, (tn, 1), 0)
    valid = (tgt != 0) & (row_ids < n_rows)               # (TILE_N, 1) bool
    # jnp.where (not multiply) so NaN/Inf garbage in masked rows cannot leak.
    ce_sum = jnp.sum(jnp.where(valid, ce_per, 0.0))
    cnt = jnp.sum(valid.astype(jnp.float32))

    # Lane-dense per-tile partials: full (8, 128) vreg, unmasked store.
    sub = jax.lax.broadcasted_iota(jnp.int32, (8, 128), 0)
    vals = jnp.where(sub == 0, ce_sum, jnp.where(sub == 1, cnt, 0.0))
    out_ref[...] = vals[None, :, :].astype(jnp.float32)


def _tpu_vmem_caps():
    """(scoped-VMEM cap, per-block f32-footprint budget), generation aware.

    Default to v7x-safe numbers (64 MiB physical VMEM per TensorCore); loosen
    only when a 128-MiB-VMEM chip (v5e/v6e) can be detected.
    """
    phys = None
    try:
        phys = int(pltpu.get_tpu_info().vmem_capacity_bytes)
    except Exception:
        phys = None
    if phys is None:
        try:
            kind = jax.devices()[0].device_kind.lower()
            if ("v5" in kind) or ("v6" in kind):
                phys = 128 * _MIB
        except Exception:
            pass
    if phys is not None and phys >= 96 * _MIB:
        return 96 * _MIB, 6 * _MIB     # v5e / v6e: 128 MiB physical VMEM
    return 48 * _MIB, 4 * _MIB         # safe on v7x (64 MiB physical VMEM)


def _is_v5():
    # v5e has no bf16 VALU -> keep the f32 reduction path there.
    try:
        return "v5" in jax.devices()[0].device_kind.lower()
    except Exception:
        return False


def _choose_tile_n(n_rows, c_pad, sub, f32_budget):
    """Largest tile_n (multiple of `sub`) whose lane-padded f32 footprint fits
    the per-block budget, capped at ~half the padded N so the grid has >= 2
    steps whenever N permits (pipelining + both v7x TensorCores)."""
    tile = f32_budget // max(1, c_pad * 4)
    tile = max(sub, (tile // sub) * sub)
    n_pad = _round_up(n_rows, sub)
    half = max(sub, _round_up(max(1, n_pad // 2), sub))
    return min(tile, half)


def focal_loss(logits, target, gamma=2, tile_n=None):
    """logits: (N, C) float (f32 or bf16); target: (N,) int class indices.

    Returns scalar focal loss matching the PyTorch FocalLoss module
    (CrossEntropyLoss(ignore_index=0, reduction='mean'), focal modulation).
    """
    N, C = logits.shape
    target2d = target.reshape(N, 1).astype(jnp.int32)

    dtype = jnp.dtype(logits.dtype)
    itemsize = dtype.itemsize
    sub = max(8, 32 // itemsize)          # native sublane tile: 8 f32, 16 bf16
    c_pad = _round_up(C, 128)             # class axis is lane-padded in VMEM

    vmem_cap, f32_budget = _tpu_vmem_caps()

    if tile_n is None:
        tile_n = _choose_tile_n(N, c_pad, sub, f32_budget)
    else:
        tile_n = max(sub, _round_up(int(tile_n), sub))
    num_tiles = pl.cdiv(N, tile_n)

    # Padding-aware VMEM accounting: (tile_n, C) blocks occupy tile_n * c_pad
    # elements, and the (tile_n, 1) int32 target block is padded to 128 lanes
    # (tile_n * 512 B).  Inputs/outputs are double-buffered by the pipeline;
    # ~5 dense f32-equivalent intermediates is a conservative in-kernel peak.
    logits_blk = tile_n * c_pad * itemsize
    tgt_blk = tile_n * 128 * 4
    out_blk = 8 * 128 * 4
    f32_blk = tile_n * c_pad * 4
    vmem_needed = 2 * (logits_blk + tgt_blk + out_blk) + 5 * f32_blk
    vmem_limit = int(min(vmem_cap, max(32 * _MIB, (3 * vmem_needed) // 2)))

    native_reduce = (dtype == jnp.bfloat16) and (not _is_v5())

    partials = pl.pallas_call(
        functools.partial(_focal_partial_kernel, n_rows=N,
                          native_reduce=native_reduce),
        out_shape=jax.ShapeDtypeStruct((num_tiles, 8, 128), jnp.float32),
        grid=(num_tiles,),
        in_specs=[
            pl.BlockSpec((tile_n, C), lambda i: (i, 0)),   # logits tile
            pl.BlockSpec((tile_n, 1), lambda i: (i, 0)),   # targets tile
        ],
        out_specs=pl.BlockSpec((1, 8, 128), lambda i: (i, 0, 0)),
        compiler_params=pltpu.CompilerParams(
            dimension_semantics=("parallel",),
            vmem_limit_bytes=vmem_limit,
        ),
    )(logits, target2d)

    # Tiny final reduction + focal modulation in the wrapper (keeps the grid
    # axis "parallel" so v7x can use both TensorCores).
    ce_sum = jnp.sum(partials[:, 0, 0])
    cnt = jnp.sum(partials[:, 1, 0])
    ce = ce_sum / cnt
    pt = jnp.exp(-ce)
    return ((1.0 - pt) ** gamma) * ce


def _reference(logits, target, gamma=2):
    # Pure-JAX reference of the PyTorch semantics (for sanity checking).
    logits = logits.astype(jnp.float32)
    logp = jax.nn.log_softmax(logits, axis=-1)
    ce_per = -jnp.take_along_axis(logp, target[:, None].astype(jnp.int32),
                                  axis=-1)[:, 0]
    valid = (target != 0).astype(jnp.float32)
    ce = jnp.sum(ce_per * valid) / jnp.sum(valid)
    pt = jnp.exp(-ce)
    return ((1.0 - pt) ** gamma) * ce


if __name__ == "__main__":
    key = jax.random.PRNGKey(0)
    k1, k2, k3 = jax.random.split(key, 3)

    # Case 1: small single-tile case (matches the module's (batch, classes)
    # CrossEntropyLoss layout), with some ignore_index=0 entries.
    N, C = 8, 16
    logits = jax.random.normal(k1, (N, C), dtype=jnp.float32)
    target = jnp.array([0, 3, 7, 0, 1, 15, 2, 9], dtype=jnp.int32)
    out = jax.block_until_ready(focal_loss(logits, target, gamma=2))
    ref = _reference(logits, target, gamma=2)
    assert jnp.isfinite(out), "non-finite focal loss (case 1)"
    assert jnp.allclose(out, ref, rtol=5e-5, atol=5e-5), (out, ref)

    # Case 2: multi-tile grid with a partial last tile (N=37, forced tile_n=16)
    # to exercise pipelined tiling + out-of-bounds row masking.
    N2, C2 = 37, 16
    logits2 = jax.random.normal(k2, (N2, C2), dtype=jnp.float32)
    target2 = jax.random.randint(k3, (N2,), 0, C2, dtype=jnp.int32)
    out2 = jax.block_until_ready(focal_loss(logits2, target2, gamma=2,
                                            tile_n=16))
    ref2 = _reference(logits2, target2, gamma=2)
    assert jnp.isfinite(out2), "non-finite focal loss (case 2)"
    assert jnp.allclose(out2, ref2, rtol=5e-5, atol=5e-5), (out2, ref2)

    # Case 3: bf16 logits fed directly to the kernel.  On v6e/v7x the row-max,
    # target select and subtraction run in native bf16 (per perf review), so
    # allow a looser tolerance vs the f32 reference (~1e-3 relative expected).
    logits3 = logits2.astype(jnp.bfloat16)
    out3 = jax.block_until_ready(focal_loss(logits3, target2, gamma=2))
    ref3 = _reference(logits3.astype(jnp.float32), target2, gamma=2)
    assert jnp.isfinite(out3), "non-finite focal loss (case 3)"
    assert jnp.allclose(out3, ref3, rtol=2e-2, atol=2e-2), (out3, ref3)

    print("KERNEL_OK")
</pallas_src>

<mosaic_0001>
module attributes {stable_mosaic.version = 11 : i64} {
  func.func @_focal_partial_kernel(%arg0: i32, %arg1: memref<8x16xf32, #tpu.memory_space<vmem>>, %arg2: memref<8x1xi32, #tpu.memory_space<vmem>>, %arg3: memref<1x8x128xf32, #tpu.memory_space<vmem>>) attributes {dimension_semantics = [#tpu.dimension_semantics<parallel>], iteration_bounds = array<i64: 1>, scalar_prefetch = 0 : i64, scratch_operands = 0 : i64, tpu.core_type = #tpu.core_type<tc>, window_params = [{transform_indices = @transform_0, window_bounds = array<i64: 8, 16>}, {transform_indices = @transform_1, window_bounds = array<i64: 8, 1>}, {transform_indices = @transform_2, window_bounds = array<i64: 1, 8, 128>}]} {
    %c0 = arith.constant 0 : index
    %c0_0 = arith.constant 0 : index
    %0 = vector.load %arg1[%c0, %c0_0] : memref<8x16xf32, #tpu.memory_space<vmem>>, vector<8x16xf32>
    %c0_1 = arith.constant 0 : index
    %c0_2 = arith.constant 0 : index
    %1 = vector.load %arg2[%c0_1, %c0_2] : memref<8x1xi32, #tpu.memory_space<vmem>>, vector<8x1xi32>
    %cst = arith.constant dense<0xFF800000> : vector<8xf32>
    %2 = vector.multi_reduction <maximumf>, %0, %cst [1] : vector<8x16xf32> to vector<8xf32>
    %3 = vector.shape_cast %2 : vector<8xf32> to vector<8x1xf32>
    %4 = tpu.iota {dimensions = array<i32: 1>} : vector<8x16xi32>
    %5 = vector.broadcast %1 : vector<8x1xi32> to vector<8x16xi32>
    %6 = arith.cmpi eq, %4, %5 : vector<8x16xi32>
    %cst_3 = arith.constant 0.000000e+00 : f32
    %7 = vector.broadcast %cst_3 : f32 to vector<8x16xf32>
    %8 = arith.select %6, %0, %7 : vector<8x16xi1>, vector<8x16xf32>
    %cst_4 = arith.constant dense<0.000000e+00> : vector<8xf32>
    %9 = vector.multi_reduction <add>, %8, %cst_4 [1] : vector<8x16xf32> to vector<8xf32>
    %10 = vector.shape_cast %9 : vector<8xf32> to vector<8x1xf32>
    %11 = vector.broadcast %3 : vector<8x1xf32> to vector<8x16xf32>
    %12 = arith.subf %0, %11 : vector<8x16xf32>
    %13 = math.exp %12 : vector<8x16xf32>
    %cst_5 = arith.constant dense<0.000000e+00> : vector<8xf32>
    %14 = vector.multi_reduction <add>, %13, %cst_5 [1] : vector<8x16xf32> to vector<8xf32>
    %15 = vector.shape_cast %14 : vector<8xf32> to vector<8x1xf32>
    %16 = math.log %15 : vector<8x1xf32>
    %17 = arith.addf %3, %16 : vector<8x1xf32>
    %18 = arith.subf %17, %10 : vector<8x1xf32>
    %c8_i32 = arith.constant 8 : i32
    %19 = arith.muli %arg0, %c8_i32 : i32
    %20 = tpu.iota {dimensions = array<i32: 0>} : vector<8x1xi32>
    %21 = vector.broadcast %19 : i32 to vector<8x1xi32>
    %22 = arith.addi %21, %20 : vector<8x1xi32>
    %c0_i32 = arith.constant 0 : i32
    %23 = vector.broadcast %c0_i32 : i32 to vector<8x1xi32>
    %24 = arith.cmpi ne, %1, %23 : vector<8x1xi32>
    %c8_i32_6 = arith.constant 8 : i32
    %25 = vector.broadcast %c8_i32_6 : i32 to vector<8x1xi32>
    %26 = arith.cmpi slt, %22, %25 : vector<8x1xi32>
    %27 = arith.andi %24, %26 : vector<8x1xi1>
    %cst_7 = arith.constant 0.000000e+00 : f32
    %28 = vector.broadcast %cst_7 : f32 to vector<8x1xf32>
    %29 = arith.select %27, %18, %28 : vector<8x1xi1>, vector<8x1xf32>
    %30 = vector.shape_cast %29 : vector<8x1xf32> to vector<1x8x1xf32>
    %cst_8 = arith.constant dense<0.000000e+00> : vector<1xf32>
    %31 = vector.multi_reduction <add>, %30, %cst_8 [1, 2] : vector<1x8x1xf32> to vector<1xf32>
    %32 = vector.shape_cast %31 : vector<1xf32> to vector<1x1x1xf32>
    %33 = vector.extract %32[0, 0, 0] : f32 from vector<1x1x1xf32>
    %34 = arith.extui %27 : vector<8x1xi1> to vector<8x1xi32>
    %35 = arith.sitofp %34 : vector<8x1xi32> to vector<8x1xf32>
    %36 = vector.shape_cast %35 : vector<8x1xf32> to vector<1x8x1xf32>
    %cst_9 = arith.constant dense<0.000000e+00> : vector<1xf32>
    %37 = vector.multi_reduction <add>, %36, %cst_9 [1, 2] : vector<1x8x1xf32> to vector<1xf32>
    %38 = vector.shape_cast %37 : vector<1xf32> to vector<1x1x1xf32>
    %39 = vector.extract %38[0, 0, 0] : f32 from vector<1x1x1xf32>
    %40 = tpu.iota {dimensions = array<i32: 0>} : vector<8x128xi32>
    %c0_i32_10 = arith.constant 0 : i32
    %41 = vector.broadcast %c0_i32_10 : i32 to vector<8x128xi32>
    %42 = arith.cmpi eq, %40, %41 : vector<8x128xi32>
    %c1_i32 = arith.constant 1 : i32
    %43 = vector.broadcast %c1_i32 : i32 to vector<8x128xi32>
    %44 = arith.cmpi eq, %40, %43 : vector<8x128xi32>
    %cst_11 = arith.constant 0.000000e+00 : f32
    %45 = vector.broadcast %39 : f32 to vector<8x128xf32>
    %46 = vector.broadcast %cst_11 : f32 to vector<8x128xf32>
    %47 = arith.select %44, %45, %46 : vector<8x128xi1>, vector<8x128xf32>
    %48 = vector.broadcast %33 : f32 to vector<8x128xf32>
    %49 = arith.select %42, %48, %47 : vector<8x128xi1>, vector<8x128xf32>
    %50 = vector.shape_cast %49 : vector<8x128xf32> to vector<1x8x128xf32>
    %c0_12 = arith.constant 0 : index
    %c0_13 = arith.constant 0 : index
    %c0_14 = arith.constant 0 : index
    %51 = vector.load %arg3[%c0_12, %c0_13, %c0_14] : memref<1x8x128xf32, #tpu.memory_space<vmem>>, vector<1x8x128xf32>
    tpu.vector_store %arg3[%c0_12, %c0_13, %c0_14], %50 {strides = array<i32>} : memref<1x8x128xf32, #tpu.memory_space<vmem>>, vector<1x8x128xf32>,
    return
  }
  func.func @transform_0(%arg0: i32) -> (i32, i32) {
    %c0_i32 = arith.constant 0 : i32
    %c0_i32_0 = arith.constant 0 : i32
    return %arg0, %c0_i32 : i32, i32
  }
  func.func @transform_1(%arg0: i32) -> (i32, i32) {
    %c0_i32 = arith.constant 0 : i32
    %c0_i32_0 = arith.constant 0 : i32
    return %arg0, %c0_i32 : i32, i32
  }
  func.func @transform_2(%arg0: i32) -> (i32, i32, i32) {
    %c0_i32 = arith.constant 0 : i32
    %c0_i32_0 = arith.constant 0 : i32
    %c0_i32_1 = arith.constant 0 : i32
    return %arg0, %c0_i32, %c0_i32_0 : i32, i32, i32
  }
}

</mosaic_0001>

<bundles_post_ra>
// kernel: tpu_custom_call.1
= control target key start
LH: loop header
LB: loop body
LE: loop exit
PB: predicated region body
PF: predicated region fallthrough
CT: control target
= control target key end

     0   :  { %vm14_vm0 = vcmask 130048   ;;  %s156_s0 = inlined_call_operand.vmem [shape: f32[8,16], index: 0, kind: input, shape index: {}]   ;;  %s157_s1 = inlined_call_operand.vmem [shape: s32[8,1], index: 1, kind: input, shape index: {}]   ;;  %s158_s2 = inlined_call_operand.hbm [shape: f32[1,8,128], index: 2, kind: output, shape index: {}]  }
   0x1   :  { %v12_v0 = vld [vmem:[%s156_s0] sm:$0xff] }
   0x2   :  { %7 = vsyncpa [#allocation3], 0  ;;  %v15_v1 = vsel %vm14_vm0, %v12_v0, -inf  ;;  %v126_v2 = vmov 0   ;;  %v13_v3 = vld [vmem:[%s157_s1] sm:$0xff]  ;;  %v18_v7 = vlaneseq  ;;  %vm47_vm3 = vcmask 7168  }
   0x3   :  { %99 = vset.pattern.permute.xlu0 %v126_v2  ;;  %vm43_vm2 = vcmp.ne.s32.totalorder %v13_v3, 0  ;;  %v127_v21 = vmov 0.0   ;;  %s128_s1 = smov [#allocation2]  }
   0x4   :  { %16 = vmax.xlane.f32.xlu0 %v15_v1  ;;  %v19_v8 = vand.u32 127, %v18_v7  ;;  %v91_v22 = vsel %vm43_vm2, 1.0, %v127_v21  ;;  %v40_v39 = vshrl.u32 %v18_v7, 7  ;;  %s83_s13 = sshll.u32 %s128_s1, 4  ;;  %s84_s13 = int_to_ptr.vmem [resolvable:$true] %s83_s13 }
   0x5   :  { %v60_v24 = vsel %vm47_vm3, %v91_v22, 0.0  ;;  %s104_s15 = scalar_lea.vmem %s84_s13, 128  ;;  %p109_p1 = scmp.lt.s32.totalorder %s84_s13, %s84_s13 }
   0x6   :  { %vm71_vm4 = vcmp.eq.s32.totalorder %v40_v39, 1  ;;  %vm70_vm5 = vcmp.eq.s32.totalorder %v40_v39, 0  ;;  %p105_p0 = scmp.ne.s32.totalorder %s84_s13, %s104_s15  ;;  %p110_p2 = scmp.lt.s32.totalorder %s104_s15, %s104_s15 }
   0x8   :  { %p111_p3 = por %p110_p2, %p109_p1 }
   0xa   :  { %p112_p4 = pnand %p111_p3, %p105_p0 }
  0x1a   :  { %21 = vperm.xlu0 %99, %v13_v3  }
  0x8d   :  { %v17_v4 = vpop.xlane.xlu0 %16 }
  0x8e   :  { %v28_v5 = vsub.f32 %v12_v0, %v17_v4 }
  0x90   :  { %v29_v6 = vmul.f32 1.442695, %v28_v5 }
  0x92   :  { %100 = vpow2.f32 %v29_v6 }
  0x95   :  { %v22_v9 = vpop.permute.xlu0 %21 }
  0x96   :  { %vm23_vm1 = vcmp.eq.s32.totalorder %v19_v8, %v22_v9 }
  0x97   :  { %v24_v11 = vsel %vm23_vm1, %v12_v0, 0.0 }
  0x98   :  { %v25_v13 = vsel %vm14_vm0, %v24_v11, 0.0 }
  0x9f   :  { %v101_v10 = vpop.eup %100 }
  0xa0   :  { %v31_v12 = vsel %vm14_vm0, %v101_v10, 0.0 }
  0xa1   :  { %32 = vadd.xlane.f32.xlu1 %v31_v12 }
  0xa5   :  { %26 = vadd.xlane.f32.xlu1 %v25_v13 }
 0x12a   :  { %v33_v14 = vpop.xlane.xlu1 %32 }
 0x12b   :  { %102 = vlog2.f32 %v33_v14 }
 0x12e   :  { %v27_v17 = vpop.xlane.xlu1 %26 }
 0x138   :  { %v103_v15 = vpop.eup %102 }
 0x139   :  { %v35_v16 = vmul.f32 0.6931472, %v103_v15 }
 0x13b   :  { %v36_v18 = vadd.f32 %v35_v16, %v17_v4 }
 0x13d   :  { %v37_v19 = vsub.f32 %v36_v18, %v27_v17 }
 0x13f   :  { %v46_v20 = vsel %vm43_vm2, %v37_v19, 0.0 }
 0x140   :  { %v48_v23 = vsel %vm47_vm3, %v46_v20, 0.0 }
 0x141   :  { %49 = vadd.xlane.f32.xlu1 %v48_v23 }
 0x145   :  { %61 = vadd.xlane.f32.xlu1 %v60_v24 }
 0x1ca   :  { %v50_v25 = vpop.xlane.xlu1 %49 }
 0x1cb   :  { %v51_v26 = vrot.slane %v50_v25, 4 }
 0x1cd   :  { %v52_v27 = vadd.f32 %v51_v26, %v50_v25 }
 0x1ce   :  { %v62_v28 = vpop.xlane.xlu1 %61 }
 0x1cf   :  { %v53_v29 = vrot.slane %v52_v27, 2  ;;  %v63_v30 = vrot.slane %v62_v28, 4 }
 0x1d1   :  { %v64_v31 = vadd.f32 %v63_v30, %v62_v28  ;;  %v54_v32 = vadd.f32 %v53_v29, %v52_v27 }
 0x1d3   :  { %v65_v33 = vrot.slane %v64_v31, 2  ;;  %v55_v34 = vrot.slane %v54_v32, 1 }
 0x1d5   :  { %v66_v35 = vadd.f32 %v65_v33, %v64_v31  ;;  %v56_v36 = vadd.f32 %v55_v34, %v54_v32 }
 0x1d7   :  { %92 = vpush %v56_v36  ;;  %v67_v37 = vrot.slane %v66_v35, 1 }
 0x1d9   :  { %v68_v38 = vadd.f32 %v67_v37, %v66_v35 }
 0x1db   :  { %94 = vpush %v68_v38 }
 0x208   :  { %s93_s0 = spop %92 }
 0x209   :  { %v74_v41 = vstv %s93_s0 }
 0x20c   :  { %s95_s14 = spop %94 }
 0x20d   :  { %v72_v40 = vstv %s95_s14 }
 0x20e   :  { %v73_v42 = vsel %vm71_vm4, %v72_v40, 0.0 }
 0x20f   :  { %v75_v43 = vsel %vm70_vm5, %v74_v41, %v73_v42 }
 0x210   :  { %76 = vst [vmem:[#allocation2] sm:$0xff] %v75_v43 }
 0x211   :  { %115 = shalt.err (!%p112_p4)
}
 0x212   :  { %86 = dma.vmem_to_hbm [thread:$0]  %s84_s13, 128, %s158_s2, [#allocation3]  }
 0x213   :  { %124 = dma.done.wait [#allocation3], 128  }
 0x214   :  { %125 = vsyncadd [#allocation3], 4294967168 }
 0x215   :  { %90 = vsyncpa [#allocation3], 1 }

</bundles_post_ra>
